<compile_context>
chip_gen: v7x
topology: tpu7x:2x2x1
jax: 0.10.0
libtpu: 0.0.40
codegen_flags: <defaults>
</compile_context>

<pallas_src>
import types

import jax
import jax.numpy as jnp
from jax import lax
from jax.experimental import pallas as pl
from jax.experimental.pallas import tpu as pltpu


NEG_SLOPE = 0.01  # nn.LeakyReLU default negative_slope


def _leaky_relu(v):
    return jnp.where(v > 0, v, NEG_SLOPE * v)


def _cdiv(a, b):
    return (a + b - 1) // b


def _round_up(n, m):
    return _cdiv(n, m) * m


# Contract the last dim of both operands: w (H,F) x x (TILE_B,F) -> (H, TILE_B).
_TRANS_RHS_DIMS = (((1,), (1,)), ((), ()))


def make_net_kernel(n_layers, tile_b, batch_size):
    """Ref order:
        x (TILE_B, F) f32, y (1, TILE_B) f32,
        w_in (H,F) bf16, b_in (H,1) f32, w_hid (H,H) bf16, b_hid (H,1) f32,
        w_head (H,1) f32, b_head (1,1) f32,
        preds_out (1, TILE_B) f32, loss_out (1, 1, 128) f32
    """
    last_tile_ragged = (batch_size % tile_b) != 0

    def kernel(x_ref, y_ref, w_in_ref, b_in_ref, w_hid_ref, b_hid_ref,
               w_head_ref, b_head_ref, preds_ref, loss_ref):
        # ---- cnn: Linear(F,H)+LeakyReLU, then the SAME Linear(H,H)+LeakyReLU xN
        x = x_ref[...].astype(jnp.bfloat16)                      # (TILE_B, F)
        h = lax.dot_general(w_in_ref[...], x, _TRANS_RHS_DIMS,
                            preferred_element_type=jnp.float32)  # (H, TILE_B)
        h = _leaky_relu(h + b_in_ref[...])
        w_hid = w_hid_ref[...]
        b_hid = b_hid_ref[...]
        for _ in range(n_layers):                                # shared weights
            h = _leaky_relu(jnp.dot(w_hid, h.astype(jnp.bfloat16),
                                    preferred_element_type=jnp.float32) + b_hid)

        # ---- head (H -> 1): VPU broadcast-mul + XLU sublane reduce (MXU skipped)
        preds = _leaky_relu(jnp.sum(w_head_ref[...] * h, axis=0, keepdims=True)
                            + b_head_ref[...])                   # (1, TILE_B)
        preds_ref[...] = preds                                    # lane-dense store

        # ---- loss terms, reduced in-kernel to one partial sum per tile
        y = y_ref[...]                                            # (1, TILE_B)
        num = jnp.abs(y - preds)
        den = jnp.abs(0.01 + y) + jnp.abs(0.01 + preds)
        lterm = num / den                                         # exact (f32 contract)
        if last_tile_ragged:
            # mask lanes past the true batch (ragged last tile reads undefined rows)
            lane = lax.broadcasted_iota(jnp.int32, (1, tile_b), 1)
            valid = (pl.program_id(0) * tile_b + lane) < batch_size
            lterm = jnp.where(valid, lterm, 0.0)
        loss_ref[...] = jnp.full(loss_ref.shape, jnp.sum(lterm), dtype=jnp.float32)

    return kernel


def init_params(key, n_features, n_hidden, n_classes=1):
    """Weights in PyTorch (out, in) layout; matmul weights stored bf16 (MXU
    operands), biases/head stay f32.  The hidden Linear(H,H) is a single shared
    layer, matching the PyTorch module's repeated-module semantics.  The head
    weight is kept as (H, 1) so the 32->1 head runs on VPU+XLU."""
    assert n_classes == 1
    ks = jax.random.split(key, 6)

    def lin(kw, kb, dout, din):
        bound = float(din) ** -0.5
        w = jax.random.uniform(kw, (dout, din), jnp.float32, -bound, bound)
        b = jax.random.uniform(kb, (dout, 1), jnp.float32, -bound, bound)
        return w, b

    w_in, b_in = lin(ks[0], ks[1], n_hidden, n_features)
    w_hid, b_hid = lin(ks[2], ks[3], n_hidden, n_hidden)      # shared hidden layer
    w_head, b_head = lin(ks[4], ks[5], n_classes, n_hidden)
    return {
        "w_in": w_in.astype(jnp.bfloat16), "b_in": b_in,
        "w_hid": w_hid.astype(jnp.bfloat16), "b_hid": b_hid,
        "w_head": jnp.transpose(w_head),                       # (H, 1) f32
        "b_head": b_head.reshape(1, 1),                        # (1, 1) f32
    }


def net_forward(batch, params, n_layers, *, tile_b=4096):
    """Pallas-backed equivalent of Net.forward."""
    x = batch["input"].astype(jnp.float32)            # (B, F) == batch['input'].float()
    y = batch["target_norm"].astype(jnp.float32)      # (B,)
    B, F = x.shape
    H = params["w_in"].shape[0]

    # Large batch tiles (per-grid-step fixed cost dominates tiny per-tile work),
    # but keep >= 2 tiles for large batches so both v7x TensorCores get work.
    if B <= 256:
        TILE_B = B                                     # single full-array block
    else:
        TILE_B = max(128, min(tile_b, _round_up(_cdiv(B, 2), 128)))
    n_tiles = _cdiv(B, TILE_B)

    y_row = y.reshape(1, B)                            # metadata-only re-layout

    weight_order = ("w_in", "b_in", "w_hid", "b_hid", "w_head", "b_head")
    weights = [params[k] for k in weight_order]

    param_bytes = sum(int(w.size) * w.dtype.itemsize for w in weights)
    flops = 2 * B * (F * H + n_layers * H * H + H) + 10 * B
    bytes_accessed = 4 * (x.size + y_row.size + B + n_tiles * 128) + param_bytes

    kernel = make_net_kernel(n_layers, TILE_B, B)

    preds_row, loss_parts = pl.pallas_call(
        kernel,
        grid=(n_tiles,),
        in_specs=[
            pl.BlockSpec((TILE_B, F), lambda i: (i, 0)),     # x: contiguous native tile
            pl.BlockSpec((1, TILE_B), lambda i: (0, i)),     # y: lane-dense row
        ] + [pl.BlockSpec(w.shape, lambda i: (0, 0)) for w in weights],  # resident
        out_specs=(
            pl.BlockSpec((1, TILE_B), lambda i: (0, i)),     # preds: lane-dense row
            pl.BlockSpec((1, 1, 128), lambda i: (i, 0, 0)),  # per-tile loss partials
        ),
        out_shape=(
            jax.ShapeDtypeStruct((1, B), jnp.float32),
            jax.ShapeDtypeStruct((n_tiles, 1, 128), jnp.float32),
        ),
        compiler_params=pltpu.CompilerParams(
            dimension_semantics=("parallel",),               # megacore sharding on v7x
        ),
        cost_estimate=pl.CostEstimate(
            flops=int(flops), transcendentals=0, bytes_accessed=int(bytes_accessed)),
    )(x, y_row, *weights)

    preds = preds_row[0]                                # (B,), matches .squeeze(-1)
    loss = jnp.sum(loss_parts[:, 0, 0]) / B             # mean over the true batch only
    return {"loss": loss, "preds": preds, "target_norm": y}


def net_forward_ref(batch, params, n_layers):
    """Pure-JAX reference replicating the kernel numerics (bf16 matmul operands,
    f32 accumulation / elementwise, shared hidden layer)."""
    x = batch["input"].astype(jnp.float32)
    y = batch["target_norm"].astype(jnp.float32)
    h = jnp.dot(params["w_in"], x.astype(jnp.bfloat16).T,
                preferred_element_type=jnp.float32)
    h = _leaky_relu(h + params["b_in"])
    for _ in range(n_layers):
        h = _leaky_relu(jnp.dot(params["w_hid"], h.astype(jnp.bfloat16),
                                preferred_element_type=jnp.float32) + params["b_hid"])
    preds = _leaky_relu(jnp.sum(params["w_head"] * h, axis=0) + params["b_head"][0, 0])
    loss = jnp.mean(jnp.abs(y - preds) / (jnp.abs(0.01 + y) + jnp.abs(0.01 + preds)))
    return {"loss": loss, "preds": preds, "target_norm": y}


def net_forward_ref_f32(batch, params, n_layers):
    """Independent all-f32 reference in the original (batch, feature) orientation."""
    x = batch["input"].astype(jnp.float32)
    y = batch["target_norm"].astype(jnp.float32)
    w_in = params["w_in"].astype(jnp.float32)
    w_hid = params["w_hid"].astype(jnp.float32)
    h = _leaky_relu(x @ w_in.T + params["b_in"][:, 0])
    for _ in range(n_layers):
        h = _leaky_relu(h @ w_hid.T + params["b_hid"][:, 0])
    preds = _leaky_relu(h @ params["w_head"][:, 0] + params["b_head"][0, 0])
    loss = jnp.mean(jnp.abs(y - preds) / (jnp.abs(0.01 + y) + jnp.abs(0.01 + preds)))
    return {"loss": loss, "preds": preds, "target_norm": y}


if __name__ == "__main__":
    cfg = types.SimpleNamespace(
        features=list(range(16)),   # len(features) = 16 input features
        n_hidden=32,
        n_layers=2,
        n_classes=1,
    )

    key = jax.random.PRNGKey(0)
    params = init_params(jax.random.fold_in(key, 123),
                         len(cfg.features), cfg.n_hidden, cfg.n_classes)

    # "small"             -> single full-array block (B=8).
    # "ragged_multi_tile" -> grid=2 with a partial last block (B=520, TILE_B=384),
    #                        exercising the in-kernel lane mask for the loss sum.
    for case, batch_size in (("small", 8), ("ragged_multi_tile", 520)):
        kx, ky = jax.random.split(jax.random.fold_in(key, batch_size))
        batch = {
            "input": jax.random.normal(kx, (batch_size, len(cfg.features)),
                                       dtype=jnp.float32),
            "target_norm": jax.random.normal(ky, (batch_size,), dtype=jnp.float32),
        }

        out = net_forward(batch, params, cfg.n_layers)
        jax.block_until_ready(out["loss"])
        jax.block_until_ready(out["preds"])

        ref = net_forward_ref(batch, params, cfg.n_layers)
        ref32 = net_forward_ref_f32(batch, params, cfg.n_layers)

        assert out["preds"].shape == (batch_size,), case
        assert bool(jnp.all(jnp.isfinite(out["preds"]))), case
        assert jnp.allclose(out["preds"], ref["preds"], atol=1e-4, rtol=1e-4), case
        assert jnp.allclose(out["loss"], ref["loss"], atol=1e-4, rtol=1e-4), case
        # loose sanity check vs an independent all-f32 implementation
        assert jnp.allclose(out["preds"], ref32["preds"], atol=5e-2, rtol=5e-2), case
        assert jnp.allclose(out["loss"], ref32["loss"], atol=5e-2, rtol=5e-2), case

    print("KERNEL_OK")
</pallas_src>

<mosaic_0001>
module attributes {stable_mosaic.version = 11 : i64} {
  func.func @kernel(%arg0: i32, %arg1: memref<8x16xf32, #tpu.memory_space<vmem>>, %arg2: memref<1x8xf32, #tpu.memory_space<vmem>>, %arg3: memref<32x16xbf16, #tpu.memory_space<vmem>>, %arg4: memref<32x1xf32, #tpu.memory_space<vmem>>, %arg5: memref<32x32xbf16, #tpu.memory_space<vmem>>, %arg6: memref<32x1xf32, #tpu.memory_space<vmem>>, %arg7: memref<32x1xf32, #tpu.memory_space<vmem>>, %arg8: memref<1x1xf32, #tpu.memory_space<vmem>>, %arg9: memref<1x8xf32, #tpu.memory_space<vmem>>, %arg10: memref<1x1x128xf32, #tpu.memory_space<vmem>>) attributes {dimension_semantics = [#tpu.dimension_semantics<parallel>], iteration_bounds = array<i64: 1>, scalar_prefetch = 0 : i64, scratch_operands = 0 : i64, tpu.core_type = #tpu.core_type<tc>, window_params = [{transform_indices = @transform_0, window_bounds = array<i64: 8, 16>}, {transform_indices = @transform_1, window_bounds = array<i64: 1, 8>}, {pipeline_mode = #tpu.pipeline_mode<synchronous>, transform_indices = @transform_2, window_bounds = array<i64: 32, 16>}, {pipeline_mode = #tpu.pipeline_mode<synchronous>, transform_indices = @transform_3, window_bounds = array<i64: 32, 1>}, {pipeline_mode = #tpu.pipeline_mode<synchronous>, transform_indices = @transform_4, window_bounds = array<i64: 32, 32>}, {pipeline_mode = #tpu.pipeline_mode<synchronous>, transform_indices = @transform_5, window_bounds = array<i64: 32, 1>}, {pipeline_mode = #tpu.pipeline_mode<synchronous>, transform_indices = @transform_6, window_bounds = array<i64: 32, 1>}, {pipeline_mode = #tpu.pipeline_mode<synchronous>, transform_indices = @transform_7, window_bounds = array<i64: 1, 1>}, {transform_indices = @transform_8, window_bounds = array<i64: 1, 8>}, {transform_indices = @transform_9, window_bounds = array<i64: 1, 1, 128>}]} {
    %c0 = arith.constant 0 : index
    %c0_0 = arith.constant 0 : index
    %0 = vector.load %arg1[%c0, %c0_0] : memref<8x16xf32, #tpu.memory_space<vmem>>, vector<8x16xf32>
    %1 = arith.truncf %0 : vector<8x16xf32> to vector<8x16xbf16>
    %c0_1 = arith.constant 0 : index
    %c0_2 = arith.constant 0 : index
    %2 = vector.load %arg3[%c0_1, %c0_2] : memref<32x16xbf16, #tpu.memory_space<vmem>>, vector<32x16xbf16>
    %cst = arith.constant dense<0.000000e+00> : vector<32x8xf32>
    %3 = tpu.matmul %2, %1, %cst {dimension_numbers = #tpu.dot_dimension_numbers<[1], [1], [0], [0], [0, 0, 1, 0], [], []>} : vector<32x16xbf16>, vector<8x16xbf16>, vector<32x8xf32> -> vector<32x8xf32>
    %c0_3 = arith.constant 0 : index
    %c0_4 = arith.constant 0 : index
    %4 = vector.load %arg4[%c0_3, %c0_4] : memref<32x1xf32, #tpu.memory_space<vmem>>, vector<32x1xf32>
    %5 = vector.broadcast %4 : vector<32x1xf32> to vector<32x8xf32>
    %6 = arith.addf %3, %5 : vector<32x8xf32>
    %cst_5 = arith.constant 0.000000e+00 : f32
    %7 = vector.broadcast %cst_5 : f32 to vector<32x8xf32>
    %8 = arith.cmpf ogt, %6, %7 : vector<32x8xf32>
    %cst_6 = arith.constant 0.00999999977 : f32
    %9 = vector.broadcast %cst_6 : f32 to vector<32x8xf32>
    %10 = arith.mulf %9, %6 : vector<32x8xf32>
    %11 = arith.select %8, %6, %10 : vector<32x8xi1>, vector<32x8xf32>
    %c0_7 = arith.constant 0 : index
    %c0_8 = arith.constant 0 : index
    %12 = vector.load %arg5[%c0_7, %c0_8] : memref<32x32xbf16, #tpu.memory_space<vmem>>, vector<32x32xbf16>
    %c0_9 = arith.constant 0 : index
    %c0_10 = arith.constant 0 : index
    %13 = vector.load %arg6[%c0_9, %c0_10] : memref<32x1xf32, #tpu.memory_space<vmem>>, vector<32x1xf32>
    %14 = arith.truncf %11 : vector<32x8xf32> to vector<32x8xbf16>
    %cst_11 = arith.constant dense<0.000000e+00> : vector<32x8xf32>
    %15 = tpu.matmul %12, %14, %cst_11 {dimension_numbers = #tpu.dot_dimension_numbers<[1], [0], [0], [1], [0, 0, 1, 1], [], []>} : vector<32x32xbf16>, vector<32x8xbf16>, vector<32x8xf32> -> vector<32x8xf32>
    %16 = vector.broadcast %13 : vector<32x1xf32> to vector<32x8xf32>
    %17 = arith.addf %15, %16 : vector<32x8xf32>
    %cst_12 = arith.constant 0.000000e+00 : f32
    %18 = vector.broadcast %cst_12 : f32 to vector<32x8xf32>
    %19 = arith.cmpf ogt, %17, %18 : vector<32x8xf32>
    %cst_13 = arith.constant 0.00999999977 : f32
    %20 = vector.broadcast %cst_13 : f32 to vector<32x8xf32>
    %21 = arith.mulf %20, %17 : vector<32x8xf32>
    %22 = arith.select %19, %17, %21 : vector<32x8xi1>, vector<32x8xf32>
    %23 = arith.truncf %22 : vector<32x8xf32> to vector<32x8xbf16>
    %cst_14 = arith.constant dense<0.000000e+00> : vector<32x8xf32>
    %24 = tpu.matmul %12, %23, %cst_14 {dimension_numbers = #tpu.dot_dimension_numbers<[1], [0], [0], [1], [0, 0, 1, 1], [], []>} : vector<32x32xbf16>, vector<32x8xbf16>, vector<32x8xf32> -> vector<32x8xf32>
    %25 = vector.broadcast %13 : vector<32x1xf32> to vector<32x8xf32>
    %26 = arith.addf %24, %25 : vector<32x8xf32>
    %cst_15 = arith.constant 0.000000e+00 : f32
    %27 = vector.broadcast %cst_15 : f32 to vector<32x8xf32>
    %28 = arith.cmpf ogt, %26, %27 : vector<32x8xf32>
    %cst_16 = arith.constant 0.00999999977 : f32
    %29 = vector.broadcast %cst_16 : f32 to vector<32x8xf32>
    %30 = arith.mulf %29, %26 : vector<32x8xf32>
    %31 = arith.select %28, %26, %30 : vector<32x8xi1>, vector<32x8xf32>
    %c0_17 = arith.constant 0 : index
    %c0_18 = arith.constant 0 : index
    %32 = vector.load %arg7[%c0_17, %c0_18] : memref<32x1xf32, #tpu.memory_space<vmem>>, vector<32x1xf32>
    %33 = vector.broadcast %32 : vector<32x1xf32> to vector<32x8xf32>
    %34 = arith.mulf %33, %31 : vector<32x8xf32>
    %cst_19 = arith.constant dense<0.000000e+00> : vector<8xf32>
    %35 = vector.multi_reduction <add>, %34, %cst_19 [0] : vector<32x8xf32> to vector<8xf32>
    %36 = vector.shape_cast %35 : vector<8xf32> to vector<1x8xf32>
    %c0_20 = arith.constant 0 : index
    %c0_21 = arith.constant 0 : index
    %37 = vector.load %arg8[%c0_20, %c0_21] : memref<1x1xf32, #tpu.memory_space<vmem>>, vector<1x1xf32>
    %38 = vector.broadcast %37 : vector<1x1xf32> to vector<1x8xf32>
    %39 = arith.addf %36, %38 : vector<1x8xf32>
    %cst_22 = arith.constant 0.000000e+00 : f32
    %40 = vector.broadcast %cst_22 : f32 to vector<1x8xf32>
    %41 = arith.cmpf ogt, %39, %40 : vector<1x8xf32>
    %cst_23 = arith.constant 0.00999999977 : f32
    %42 = vector.broadcast %cst_23 : f32 to vector<1x8xf32>
    %43 = arith.mulf %42, %39 : vector<1x8xf32>
    %44 = arith.select %41, %39, %43 : vector<1x8xi1>, vector<1x8xf32>
    %c0_24 = arith.constant 0 : index
    %c0_25 = arith.constant 0 : index
    %45 = vector.load %arg9[%c0_24, %c0_25] : memref<1x8xf32, #tpu.memory_space<vmem>>, vector<1x8xf32>
    tpu.vector_store %arg9[%c0_24, %c0_25], %44 {strides = array<i32>} : memref<1x8xf32, #tpu.memory_space<vmem>>, vector<1x8xf32>,
    %c0_26 = arith.constant 0 : index
    %c0_27 = arith.constant 0 : index
    %46 = vector.load %arg2[%c0_26, %c0_27] : memref<1x8xf32, #tpu.memory_space<vmem>>, vector<1x8xf32>
    %47 = arith.subf %46, %44 : vector<1x8xf32>
    %48 = math.absf %47 : vector<1x8xf32>
    %cst_28 = arith.constant 0.00999999977 : f32
    %49 = vector.broadcast %cst_28 : f32 to vector<1x8xf32>
    %50 = arith.addf %49, %46 : vector<1x8xf32>
    %51 = math.absf %50 : vector<1x8xf32>
    %cst_29 = arith.constant 0.00999999977 : f32
    %52 = vector.broadcast %cst_29 : f32 to vector<1x8xf32>
    %53 = arith.addf %52, %44 : vector<1x8xf32>
    %54 = math.absf %53 : vector<1x8xf32>
    %55 = arith.addf %51, %54 : vector<1x8xf32>
    %56 = arith.divf %48, %55 : vector<1x8xf32>
    %57 = vector.shape_cast %56 : vector<1x8xf32> to vector<1x1x8xf32>
    %cst_30 = arith.constant dense<0.000000e+00> : vector<1xf32>
    %58 = vector.multi_reduction <add>, %57, %cst_30 [1, 2] : vector<1x1x8xf32> to vector<1xf32>
    %59 = vector.shape_cast %58 : vector<1xf32> to vector<1x1x1xf32>
    %60 = vector.extract %59[0, 0, 0] : f32 from vector<1x1x1xf32>
    %61 = vector.broadcast %60 : f32 to vector<1x1x128xf32>
    %c0_31 = arith.constant 0 : index
    %c0_32 = arith.constant 0 : index
    %c0_33 = arith.constant 0 : index
    %62 = vector.load %arg10[%c0_31, %c0_32, %c0_33] : memref<1x1x128xf32, #tpu.memory_space<vmem>>, vector<1x1x128xf32>
    tpu.vector_store %arg10[%c0_31, %c0_32, %c0_33], %61 {strides = array<i32>} : memref<1x1x128xf32, #tpu.memory_space<vmem>>, vector<1x1x128xf32>,
    return
  }
  func.func @transform_0(%arg0: i32) -> (i32, i32) {
    %c0_i32 = arith.constant 0 : i32
    %c0_i32_0 = arith.constant 0 : i32
    return %arg0, %c0_i32 : i32, i32
  }
  func.func @transform_1(%arg0: i32) -> (i32, i32) {
    %c0_i32 = arith.constant 0 : i32
    %c0_i32_0 = arith.constant 0 : i32
    return %c0_i32, %arg0 : i32, i32
  }
  func.func @transform_2(%arg0: i32) -> (i32, i32) {
    %c0_i32 = arith.constant 0 : i32
    %c0_i32_0 = arith.constant 0 : i32
    %c0_i32_1 = arith.constant 0 : i32
    return %c0_i32, %c0_i32_0 : i32, i32
  }
  func.func @transform_3(%arg0: i32) -> (i32, i32) {
    %c0_i32 = arith.constant 0 : i32
    %c0_i32_0 = arith.constant 0 : i32
    %c0_i32_1 = arith.constant 0 : i32
    return %c0_i32, %c0_i32_0 : i32, i32
  }
  func.func @transform_4(%arg0: i32) -> (i32, i32) {
    %c0_i32 = arith.constant 0 : i32
    %c0_i32_0 = arith.constant 0 : i32
    %c0_i32_1 = arith.constant 0 : i32
    return %c0_i32, %c0_i32_0 : i32, i32
  }
  func.func @transform_5(%arg0: i32) -> (i32, i32) {
    %c0_i32 = arith.constant 0 : i32
    %c0_i32_0 = arith.constant 0 : i32
    %c0_i32_1 = arith.constant 0 : i32
    return %c0_i32, %c0_i32_0 : i32, i32
  }
  func.func @transform_6(%arg0: i32) -> (i32, i32) {
    %c0_i32 = arith.constant 0 : i32
    %c0_i32_0 = arith.constant 0 : i32
    %c0_i32_1 = arith.constant 0 : i32
    return %c0_i32, %c0_i32_0 : i32, i32
  }
  func.func @transform_7(%arg0: i32) -> (i32, i32) {
    %c0_i32 = arith.constant 0 : i32
    %c0_i32_0 = arith.constant 0 : i32
    %c0_i32_1 = arith.constant 0 : i32
    return %c0_i32, %c0_i32_0 : i32, i32
  }
  func.func @transform_8(%arg0: i32) -> (i32, i32) {
    %c0_i32 = arith.constant 0 : i32
    %c0_i32_0 = arith.constant 0 : i32
    return %c0_i32, %arg0 : i32, i32
  }
  func.func @transform_9(%arg0: i32) -> (i32, i32, i32) {
    %c0_i32 = arith.constant 0 : i32
    %c0_i32_0 = arith.constant 0 : i32
    %c0_i32_1 = arith.constant 0 : i32
    return %arg0, %c0_i32, %c0_i32_0 : i32, i32, i32
  }
}

</mosaic_0001>

<bundles_post_ra>
// kernel: tpu_custom_call.1
= control target key start
LH: loop header
LB: loop body
LE: loop exit
PB: predicated region body
PF: predicated region fallthrough
CT: control target
= control target key end

     0   :  { %s673_s0 = inlined_call_operand.vmem [shape: f32[8,16], index: 0, kind: input, shape index: {}]   ;;  %s674_s1 = inlined_call_operand.vmem [shape: f32[1,8], index: 1, kind: input, shape index: {}]   ;;  %s675_s2 = inlined_call_operand.vmem [shape: bf16[32,16], index: 2, kind: input, shape index: {}]   ;;  %s676_s3 = inlined_call_operand.vmem [shape: f32[32,1], index: 3, kind: input, shape index: {}]   ;;  %s677_s4 = inlined_call_operand.vmem [shape: bf16[32,32], index: 4, kind: input, shape index: {}]   ;;  %s678_s5 = inlined_call_operand.vmem [shape: f32[32,1], index: 5, kind: input, shape index: {}]   ;;  %s679_s6 = inlined_call_operand.vmem [shape: f32[32,1], index: 6, kind: input, shape index: {}]   ;;  %s680_s7 = inlined_call_operand.<no memory space> [shape: f32[1,1], index: 7, kind: input, shape index: {}]   ;;  %s681_s8 = inlined_call_operand.hbm [shape: f32[1,8], index: 8, kind: output, shape index: {0}]   ;;  %s682_s9 = inlined_call_operand.hbm [shape: f32[1,1,128], index: 9, kind: output, shape index: {1}]  }
   0x1   :  { %v15_v0 = vstv %s680_s7 }
   0x2   :  { %16 = vst [vmem:[#allocation2] sm:$0x1] %v15_v0 }
   0x3   :  { %17 = vsyncpa [#allocation4], 0  ;;  %v36_v1 = vld [vmem:[%s673_s0] sm:$0xff]  ;;  %vm76_vm0 = vcmask 130048   ;;  %v531_v4 = vmov 0   ;;  %v44_v7 = vld [vmem:[%s676_s3 + $0x10] sm:$0xff] }
   0x4   :  { %v37_v2 = vpack.c.bf16 %v36_v1, %v36_v1  ;;  %v477_v3 = vld [vmem:[%s675_s2] sm:$0xff]   ;;  %475 = vset.pattern.permute.xlu0 %v531_v4  ;;  %476 = vset.pattern.permute.xlu1 %v531_v4  ;;  %v43_v8 = vld [vmem:[%s676_s3 + $0x8] sm:$0xff]  ;;  %v45_v10 = vld [vmem:[%s676_s3 + $0x18] sm:$0xff] }
   0x5   :  { %v42_v5 = vld [vmem:[%s676_s3] sm:$0xff]  ;;  %449 = vmatprep.mubr.msk.bf16.mxu0 %vm76_vm0, %v477_v3  ;;  %58 = vperm.xlu1 %476, %v44_v7   ;;  %v478_v9 = vld [vmem:[%s675_s2 + $0x8] sm:$0xff]  }
   0x6   :  { %469 = vmatprep.subr.msk.bf16.mxu0 %vm76_vm0, %v37_v2  ;;  %v84_v6 = vsel %vm76_vm0, %v37_v2, 0  ;;  %48 = vperm.xlu0 %475, %v42_v5  }
   0x7   :  { %448 = vmatpush3.bf16.xpose.msra.mxu0 %v84_v6 }
   0xa   :  { %53 = vperm.xlu0 %475, %v43_v8  }
   0xb   :  { %18 = vsyncpa [#allocation6], 0  ;;  %v151_v11 = vld [vmem:[%s678_s5] sm:$0xff]  ;;  %63 = vperm.xlu1 %476, %v45_v10   ;;  %v152_v12 = vld [vmem:[%s678_s5 + $0x8] sm:$0xff]  ;;  %vm187_vm1 = vcmask 261120   ;;  %vm346_vm14 = vcmask 64512  }
   0xc   :  { %v153_v13 = vld [vmem:[%s678_s5 + $0x10] sm:$0xff]  ;;  %v154_v14 = vld [vmem:[%s678_s5 + $0x18] sm:$0xff]  ;;  %v318_v15 = vld [vmem:[%s679_s6] sm:$0xff]  ;;  %s532_s17 = smov [#allocation3]  }
   0xd   :  { %v319_v16 = vld [vmem:[%s679_s6 + $0x8] sm:$0xff]  ;;  %v320_v17 = vld [vmem:[%s679_s6 + $0x10] sm:$0xff]  ;;  %v321_v18 = vld [vmem:[%s679_s6 + $0x18] sm:$0xff] }
   0xe   :  { %450 = vmatmul.mubr.msk.bf16.vlgmr.msra.gmra.mrb[0].mxu0 %vm76_vm0, %v478_v9  ;;  %159 = vperm.xlu0 %475, %v151_v11   ;;  %v360_v19 = vld [vmem:[#allocation2] sm:$0x1]  ;;  %v480_v43 = vld [vmem:[%s677_s4 + $0x8] sm:$0xff]   ;;  %vm374_vm0 = vcmask 57344  }
   0xf   :  { %164 = vperm.xlu1 %476, %v152_v12   ;;  %v479_v20 = vld [vmem:[%s677_s4] sm:$0xff]  }
  0x10   :  { %457 = vmatprep.mubr.msk.bf16.mxu1 %vm187_vm1, %v479_v20  ;;  %465 = vmatprep.mubr.msk.bf16.mxu0 %vm187_vm1, %v479_v20 }
  0x12   :  { %169 = vperm.xlu0 %475, %v153_v13  }
  0x13   :  { %174 = vperm.xlu1 %476, %v154_v14  }
  0x16   :  { %324 = vperm.xlu0 %475, %v318_v15  }
  0x17   :  { %329 = vperm.xlu1 %476, %v319_v16  }
  0x1a   :  { %334 = vperm.xlu0 %475, %v320_v17  }
  0x1b   :  { %339 = vperm.xlu1 %476, %v321_v18  }
  0x1e   :  { %363 = vperm.xlu0 %475, %v360_v19  }
  0x84   :  { %v59_v21 = vpop.permute.xlu1 %58 }
  0x85   :  { %v49_v22 = vpop.permute.xlu0 %48 }
  0x89   :  { %v54_v29 = vpop.permute.xlu0 %53 }
  0x8a   :  { %v64_v26 = vpop.permute.xlu1 %63 }
  0x8d   :  { %v160_v44 = vpop.permute.xlu0 %159 }
  0x8e   :  { %v165_v45 = vpop.permute.xlu1 %164 }
  0x91   :  { %v170_v46 = vpop.permute.xlu0 %169 }
  0x92   :  { %v175_v50 = vpop.permute.xlu1 %174 }
  0x95   :  { %v325_v5 = vpop.permute.xlu0 %324 }
  0x96   :  { %v330_v11 = vpop.permute.xlu1 %329 }
  0x99   :  { %v335_v19 = vpop.permute.xlu0 %334 }
  0xe1   :  { %v451_v23 = vpop.f32.mrb[0].mxu0 }
  0xe2   :  { %v129_v24 = vadd.f32 %v451_v23, %v59_v21  ;;  %v120_v25 = vpop.f32.mrb[1].mxu0 }
  0xe3   :  { %v121_v27 = vadd.f32 %v120_v25, %v49_v22  ;;  %v452_v28 = vpop.f32.mrb[2].mxu0 }
  0xe4   :  { %v141_v30 = vmul.f32 0.01, %v129_v24  ;;  %v132_v31 = vadd.f32 %v452_v28, %v64_v26  ;;  %v123_v32 = vpop.f32.mrb[3].mxu0  ;;  %vm137_vm2 = vcmp.gt.f32.partialorder %v129_v24, 0.0 }
  0xe5   :  { %v139_v33 = vmul.f32 0.01, %v121_v27  ;;  %v124_v34 = vadd.f32 %v123_v32, %v54_v29  ;;  %vm135_vm4 = vcmp.gt.f32.partialorder %v121_v27, 0.0  ;;  %v366_v32 = vlaneseq }
  0xe6   :  { %vm138_vm3 = vcmp.gt.f32.partialorder %v132_v31, 0.0  ;;  %v142_v35 = vmul.f32 0.01, %v132_v31  ;;  %v145_v37 = vsel %vm137_vm2, %v129_v24, %v141_v30  ;;  %v340_v24 = vpop.permute.xlu1 %339 }
  0xe7   :  { %v140_v36 = vmul.f32 0.01, %v124_v34  ;;  %vm136_vm5 = vcmp.gt.f32.partialorder %v124_v34, 0.0  ;;  %v143_v39 = vsel %vm135_vm4, %v121_v27, %v139_v33 }
  0xe8   :  { %v146_v38 = vsel %vm138_vm3, %v132_v31, %v142_v35  ;;  %v367_v35 = vshrl.u32 %v366_v32, 7 }
  0xe9   :  { %v144_v40 = vsel %vm136_vm5, %v124_v34, %v140_v36  ;;  %v156_v41 = vpack.c.bf16 %v146_v38, %v145_v37 }
  0xea   :  { %v155_v42 = vpack.c.bf16 %v144_v40, %v143_v39  ;;  %v368_v38 = vsub.s32 0, %v367_v35  ;;  %v364_v40 = vpop.permute.xlu0 %363 }
  0xec   :  { %453 = vmatprep.subr.bf16.mxu1 %v155_v42 }
  0xed   :  { %454 = vmatpush3.bf16.msra.mxu1 %v155_v42  ;;  %v369_v42 = vrot.slane %v364_v40, %v368_v38 }
  0xee   :  { %455 = vmatprep.subr.bf16.mxu1 %v156_v41 }
  0xf1   :  { %456 = vmatpush3.bf16.msra.mxu1 %v156_v41 }
  0xf4   :  { %458 = vmatmul.mubr.msk.bf16.vlgmr.msra.gmra.mrb[0].mxu1 %vm187_vm1, %v480_v43 }
 0x1c7   :  { %v459_v47 = vpop.f32.mrb[0].mxu1 }
 0x1c8   :  { %v237_v48 = vadd.f32 %v459_v47, %v170_v46  ;;  %v228_v49 = vpop.f32.mrb[1].mxu1 }
 0x1c9   :  { %v229_v51 = vadd.f32 %v228_v49, %v160_v44  ;;  %v460_v52 = vpop.f32.mrb[2].mxu1 }
 0x1ca   :  { %v249_v53 = vmul.f32 0.01, %v237_v48  ;;  %v240_v54 = vadd.f32 %v460_v52, %v175_v50  ;;  %v231_v55 = vpop.f32.mrb[3].mxu1  ;;  %vm245_vm6 = vcmp.gt.f32.partialorder %v237_v48, 0.0 }
 0x1cb   :  { %v247_v56 = vmul.f32 0.01, %v229_v51  ;;  %v232_v57 = vadd.f32 %v231_v55, %v165_v45  ;;  %vm243_vm7 = vcmp.gt.f32.partialorder %v229_v51, 0.0 }
 0x1cc   :  { %vm246_vm8 = vcmp.gt.f32.partialorder %v240_v54, 0.0  ;;  %v250_v58 = vmul.f32 0.01, %v240_v54  ;;  %v253_v60 = vsel %vm245_vm6, %v237_v48, %v249_v53 }
 0x1cd   :  { %vm244_vm9 = vcmp.gt.f32.partialorder %v232_v57, 0.0  ;;  %v248_v59 = vmul.f32 0.01, %v232_v57  ;;  %v251_v62 = vsel %vm243_vm7, %v229_v51, %v247_v56 }
 0x1ce   :  { %v254_v61 = vsel %vm246_vm8, %v240_v54, %v250_v58 }
 0x1cf   :  { %v252_v63 = vsel %vm244_vm9, %v232_v57, %v248_v59  ;;  %v256_v0 = vpack.c.bf16 %v254_v61, %v253_v60 }
 0x1d0   :  { %v255_v1 = vpack.c.bf16 %v252_v63, %v251_v62 }
 0x1d2   :  { %461 = vmatprep.subr.bf16.mxu0 %v255_v1 }
 0x1d3   :  { %462 = vmatpush3.bf16.msra.mxu0 %v255_v1 }
 0x1d4   :  { %463 = vmatprep.subr.bf16.mxu0 %v256_v0 }
 0x1d7   :  { %464 = vmatpush3.bf16.msra.mxu0 %v256_v0 }
 0x1da   :  { %466 = vmatmul.mubr.msk.bf16.vlgmr.msra.gmra.mrb[4].mxu0 %vm187_vm1, %v480_v43 }
 0x2ad   :  { %v467_v2 = vpop.f32.mrb[4].mxu0 }
 0x2ae   :  { %v300_v3 = vadd.f32 %v467_v2, %v170_v46  ;;  %v291_v4 = vpop.f32.mrb[5].mxu0 }
 0x2af   :  { %v292_v6 = vadd.f32 %v291_v4, %v160_v44  ;;  %v468_v7 = vpop.f32.mrb[6].mxu0  ;;  %v376_v44 = vld [vmem:[%s674_s1] sm:$0x1]  ;;  %s404_s1 = sshll.u32 %s532_s17, 4  ;;  %s405_s1 = int_to_ptr.vmem [resolvable:$true] %s404_s1 }
 0x2b0   :  { %vm308_vm10 = vcmp.gt.f32.partialorder %v300_v3, 0.0  ;;  %v312_v8 = vmul.f32 0.01, %v300_v3  ;;  %v303_v9 = vadd.f32 %v468_v7, %v175_v50  ;;  %v294_v10 = vpop.f32.mrb[7].mxu0  ;;  %v379_v46 = vadd.f32 0.01, %v376_v44  ;;  %p488_p1 = scmp.lt.s32.totalorder %s405_s1, %s405_s1 }
 0x2b1   :  { %vm306_vm11 = vcmp.gt.f32.partialorder %v292_v6, 0.0  ;;  %v310_v12 = vmul.f32 0.01, %v292_v6  ;;  %v295_v13 = vadd.f32 %v294_v10, %v165_v45  ;;  %s483_s18 = scalar_lea.vmem %s405_s1, 16  ;;  %s487_s19 = scalar_lea.vmem %s405_s1, 32 }
 0x2b2   :  { %vm309_vm12 = vcmp.gt.f32.partialorder %v303_v9, 0.0  ;;  %v313_v14 = vmul.f32 0.01, %v303_v9  ;;  %v316_v15 = vsel %vm308_vm10, %v300_v3, %v312_v8  ;;  %v380_v49 = vand.u32 2147483647, %v379_v46  ;;  %p484_p0 = scmp.ne.s32.totalorder %s405_s1, %s483_s18  ;;  %p489_p2 = scmp.lt.s32.totalorder %s487_s19, %s483_s18 }
 0x2b3   :  { %v314_v16 = vsel %vm306_vm11, %v292_v6, %v310_v12  ;;  %vm307_vm13 = vcmp.gt.f32.partialorder %v295_v13, 0.0  ;;  %v311_v17 = vmul.f32 0.01, %v295_v13  ;;  %v344_v22 = vmul.f32 %v335_v19, %v316_v15 }
 0x2b4   :  { %v342_v18 = vmul.f32 %v325_v5, %v314_v16  ;;  %v317_v20 = vsel %vm309_vm12, %v303_v9, %v313_v14  ;;  %p490_p3 = por %p489_p2, %p488_p1 }
 0x2b5   :  { %v315_v21 = vsel %vm307_vm13, %v295_v13, %v311_v17  ;;  %v345_v26 = vmul.f32 %v340_v24, %v317_v20  ;;  %v350_v29 = vsel %vm346_vm14, %v344_v22, 0.0 }
 0x2b6   :  { %v343_v23 = vmul.f32 %v330_v11, %v315_v21  ;;  %v347_v25 = vsel %vm346_vm14, %v342_v18, 0.0  ;;  %p491_p4 = pnand %p490_p3, %p484_p0 }
 0x2b7   :  { %v352_v31 = vsel %vm346_vm14, %v345_v26, 0.0 }
 0x2b8   :  { %v348_v27 = vsel %vm346_vm14, %v343_v23, 0.0 }
 0x2b9   :  { %v349_v28 = vadd.f32 %v348_v27, %v347_v25 }
 0x2bb   :  { %v351_v30 = vadd.f32 %v350_v29, %v349_v28 }
 0x2bd   :  { %v353_v33 = vadd.f32 %v352_v31, %v351_v30 }
 0x2bf   :  { %v354_v34 = vrot.slane %v353_v33, 4 }
 0x2c1   :  { %v355_v36 = vadd.f32 %v354_v34, %v353_v33 }
 0x2c3   :  { %v356_v37 = vrot.slane %v355_v36, 2 }
 0x2c5   :  { %v357_v39 = vadd.f32 %v356_v37, %v355_v36 }
 0x2c7   :  { %v358_v41 = vrot.slane %v357_v39, 1 }
 0x2c9   :  { %v359_v43 = vadd.f32 %v358_v41, %v357_v39 }
 0x2cb   :  { %v370_v45 = vadd.f32 %v369_v42, %v359_v43 }
 0x2cd   :  { %vm371_vm15 = vcmp.gt.f32.partialorder %v370_v45, 0.0  ;;  %v372_v47 = vmul.f32 0.01, %v370_v45 }
 0x2cf   :  { %v373_v48 = vsel %vm371_vm15, %v370_v45, %v372_v47 }
 0x2d0   :  { %v381_v50 = vadd.f32 0.01, %v373_v48  ;;  %375 = vst.msk [vmem:[#allocation3] sm:$0x1] %vm374_vm0, %v373_v48  ;;  %v377_v53 = vsub.f32 %v376_v44, %v373_v48 }
 0x2d2   :  { %v382_v51 = vand.u32 2147483647, %v381_v50  ;;  %v378_v54 = vand.u32 2147483647, %v377_v53 }
 0x2d4   :  { %v383_v52 = vadd.f32 %v382_v51, %v380_v49 }
 0x2d6   :  { %481 = vrcp.f32 %v383_v52 }
 0x2e0   :  { %v482_v55 = vpop.eup %481 }
 0x2e1   :  { %v385_v56 = vmul.f32 %v482_v55, %v378_v54 }
 0x2e3   :  { %v386_v57 = vsel %vm374_vm0, %v385_v56, 0.0 }
 0x2e4   :  { %387 = vadd.xlane.f32.xlu1 %v386_v57 }
 0x2e5   :  { %494 = shalt.err (!%p491_p4)
}
 0x2e6   :  { %s495_s22 = scalar_lea.hbm %s681_s8, 16 }
 0x2e7   :  { %p496_p5 = scmp.ne.s32.totalorder %s681_s8, %s495_s22  ;;  %p499_p6 = scmp.lt.u32.totalorder %s495_s22, %s681_s8 }
 0x2e9   :  { %p501_p7 = pnand %p499_p6, %p496_p5 }
 0x2eb   :  { %504 = shalt.err (!%p501_p7)
}
 0x2ec   :  { %407 = dma.vmem_to_hbm [thread:$0]  %s405_s1, 16, %s681_s8, [#allocation4]  }
 0x2ed   :  { %s533_s3 = smov [#allocation5]  }
 0x2ee   :  { %s414_s28 = sshll.u32 %s533_s3, 4  ;;  %s415_s28 = int_to_ptr.vmem [resolvable:$true] %s414_s28 }
 0x2ef   :  { %s505_s30 = scalar_lea.vmem %s415_s28, 16  ;;  %s509_s10 = scalar_lea.vmem %s415_s28, 32 }
 0x2f0   :  { %p506_p8 = scmp.ne.s32.totalorder %s415_s28, %s505_s30  ;;  %p510_p9 = scmp.lt.s32.totalorder %s415_s28, %s415_s28 }
 0x2f1   :  { %p511_p10 = scmp.lt.s32.totalorder %s509_s10, %s505_s30 }
 0x2f3   :  { %p512_p11 = por %p511_p10, %p510_p9 }
 0x2f5   :  { %p513_p12 = pnand %p512_p11, %p506_p8 }
 0x371   :  { %v388_v58 = vpop.xlane.xlu1 %387 }
 0x372   :  { %v389_v59 = vrot.slane %v388_v58, 4 }
 0x374   :  { %v390_v60 = vadd.f32 %v389_v59, %v388_v58 }
 0x376   :  { %v391_v61 = vrot.slane %v390_v60, 2 }
 0x378   :  { %v392_v62 = vadd.f32 %v391_v61, %v390_v60 }
 0x37a   :  { %v393_v63 = vrot.slane %v392_v62, 1 }
 0x37c   :  { %v394_v0 = vadd.f32 %v393_v63, %v392_v62 }
 0x37e   :  { %470 = vpush %v394_v0 }
 0x3af   :  { %s471_s29 = spop %470 }
 0x3b0   :  { %v396_v1 = vstv %s471_s29 }
 0x3b1   :  { %397 = vst [vmem:[#allocation5] sm:$0x1] %v396_v1 }
 0x3b2   :  { %516 = shalt.err (!%p513_p12)
}
 0x3b3   :  { %s517_s12 = scalar_lea.hbm %s682_s9, 16 }
 0x3b4   :  { %p518_p13 = scmp.ne.s32.totalorder %s682_s9, %s517_s12  ;;  %p521_p0 = scmp.lt.u32.totalorder %s517_s12, %s682_s9 }
 0x3b6   :  { %p523_p1 = pnand %p521_p0, %p518_p13 }
 0x3b8   :  { %526 = shalt.err (!%p523_p1)
}
 0x3b9   :  { %417 = dma.vmem_to_hbm [thread:$0]  %s415_s28, 16, %s682_s9, [#allocation6]  }
 0x3ba   :  { %527 = dma.done.wait [#allocation4], 16  }
 0x3bb   :  { %528 = vsyncadd [#allocation4], 4294967280 }
 0x3bc   :  { %529 = dma.done.wait [#allocation6], 16  }
 0x3bd   :  { %530 = vsyncadd [#allocation6], 4294967280 }
 0x3be   :  { %424 = vsyncpa [#allocation4], 1 }
 0x3bf   :  { %425 = vsyncpa [#allocation6], 1 }

</bundles_post_ra>
